<compile_context>
chip_gen: v7x
topology: tpu7x:2x2x1
jax: 0.10.0
libtpu: 0.0.40
codegen_flags: <defaults>
</compile_context>

<pallas_src>
import functools

import jax
import jax.numpy as jnp
from jax import lax
from jax.experimental import pallas as pl
from jax.experimental.pallas import tpu as pltpu


def _round_up(v, m):
    return (v + m - 1) // m * m


def _fused_gcn_kernel(x_ref, adj_ref, w1_ref, b1_ref, w23_ref, b23_ref,
                      recon_ref, mu_ref, logvar_ref):
    adj = adj_ref[...]

    # gc1: h1 = relu(adj @ (x @ W1) + b1)
    s1 = jnp.dot(x_ref[...], w1_ref[...], preferred_element_type=jnp.float32)
    h1 = jnp.maximum(
        jnp.dot(adj, s1, preferred_element_type=jnp.float32) + b1_ref[...],
        0.0)

    # gc2|gc3 fused: one wide matmul over W23 = [W2 | W3] (each half padded
    # to 128 lanes).  out23[:, :Op] = mu, out23[:, Op:] = logvar.
    s23 = jnp.dot(h1, w23_ref[...], preferred_element_type=jnp.float32)
    out23 = jnp.dot(adj, s23, preferred_element_type=jnp.float32) + b23_ref[...]

    op = mu_ref.shape[1]                      # 128-lane vreg-boundary split
    mu = out23[:, :op]
    logvar = out23[:, op:2 * op]

    mu_ref[...] = mu.astype(mu_ref.dtype)
    logvar_ref[...] = logvar.astype(logvar_ref.dtype)

    # Decoder on z = mu (eval-mode reparameterize): recon = mu @ mu.T.
    # IMPORTANT: mu half only -- padded (zero) lanes of mu contribute nothing,
    # and logvar lanes are excluded, so this equals the unpadded z @ z.T.
    recon = lax.dot_general(mu, mu, (((1,), (1,)), ((), ())),
                            preferred_element_type=jnp.float32)
    recon_ref[...] = recon.astype(recon_ref.dtype)


def prepare_params(params, lane=128):
    """One-time (static) param preparation: fuse W2|W3, pad out-dim to 128."""
    hidden = params["w1"].shape[1]
    out = params["w2"].shape[1]
    op = _round_up(out, lane)

    w2p = jnp.pad(params["w2"], ((0, 0), (0, op - out)))
    w3p = jnp.pad(params["w3"], ((0, 0), (0, op - out)))
    b2p = jnp.pad(params["b2"], (0, op - out))
    b3p = jnp.pad(params["b3"], (0, op - out))

    return {
        "w1": params["w1"],                                   # (f_in, hidden)
        "b1": params["b1"].reshape(1, hidden),                # (1, hidden)
        "w23": jnp.concatenate([w2p, w3p], axis=1),           # (hidden, 2*op)
        "b23": jnp.concatenate([b2p, b3p]).reshape(1, 2 * op),  # (1, 2*op)
    }


@functools.partial(jax.jit, static_argnames=("out_features",))
def gcn_nomal_forward(x, adj, pp, out_features):
    """GCNModelNomal.forward (eval mode): returns (recon, mu, logvar, z)."""
    N, f_in = x.shape
    hidden = pp["w1"].shape[1]
    op2 = pp["w23"].shape[1]
    op = op2 // 2
    assert adj.shape == (N, N)
    assert out_features <= op

    # Advisory cost estimate for XLA scheduling around the custom call.
    flops = 2 * (N * f_in * hidden + N * N * hidden
                 + N * hidden * op2 + N * N * op2 + N * op * N)
    bytes_accessed = 4 * (N * f_in + N * N + f_in * hidden + hidden
                          + hidden * op2 + op2
                          + N * N + 2 * N * op)
    cost = pl.CostEstimate(flops=flops, transcendentals=0,
                           bytes_accessed=bytes_accessed)

    recon, mu_p, logvar_p = pl.pallas_call(
        _fused_gcn_kernel,
        out_shape=(
            jax.ShapeDtypeStruct((N, N), jnp.float32),
            jax.ShapeDtypeStruct((N, op), jnp.float32),
            jax.ShapeDtypeStruct((N, op), jnp.float32),
        ),
        grid_spec=pl.GridSpec(
            grid=(1,),
            in_specs=[
                pl.BlockSpec((N, f_in), lambda i: (0, 0)),      # x (natural)
                pl.BlockSpec((N, N), lambda i: (0, 0)),         # adj (dense)
                pl.BlockSpec((f_in, hidden), lambda i: (0, 0)),  # W1 (natural)
                pl.BlockSpec((1, hidden), lambda i: (0, 0)),    # b1
                pl.BlockSpec((hidden, op2), lambda i: (0, 0)),  # W2|W3 fused
                pl.BlockSpec((1, op2), lambda i: (0, 0)),       # b2|b3 fused
            ],
            out_specs=(
                pl.BlockSpec((N, N), lambda i: (0, 0)),         # recon
                pl.BlockSpec((N, op), lambda i: (0, 0)),        # mu (padded)
                pl.BlockSpec((N, op), lambda i: (0, 0)),        # logvar (padded)
            ),
        ),
        compiler_params=pltpu.CompilerParams(
            dimension_semantics=("arbitrary",)),
        cost_estimate=cost,
    )(x, adj, pp["w1"], pp["b1"], pp["w23"], pp["b23"])

    mu = mu_p[:, :out_features]
    logvar = logvar_p[:, :out_features]
    z = mu  # eval-mode reparameterize
    return recon, mu, logvar, z


def init_params(key, in_features, hidden_dim, out_features):
    """Deterministic init matching GraphConvolution.reset_parameters."""
    def glorot_uniform(k, fan_in, fan_out, shape):
        r = jnp.sqrt(6.0 / (fan_in + fan_out))
        return jax.random.uniform(k, shape, jnp.float32, minval=-r, maxval=r)

    ks = jax.random.split(key, 6)
    return {
        "w1": glorot_uniform(ks[0], in_features, hidden_dim,
                             (in_features, hidden_dim)),
        "b1": glorot_uniform(ks[1], in_features, hidden_dim, (hidden_dim,)),
        "w2": glorot_uniform(ks[2], hidden_dim, out_features,
                             (hidden_dim, out_features)),
        "b2": glorot_uniform(ks[3], hidden_dim, out_features, (out_features,)),
        "w3": glorot_uniform(ks[4], hidden_dim, out_features,
                             (hidden_dim, out_features)),
        "b3": glorot_uniform(ks[5], hidden_dim, out_features, (out_features,)),
    }


def _reference(x, adj, params):
    """Pure-JAX reference (eval-mode GCNModelNomal.forward)."""
    h1 = jnp.maximum(adj @ (x @ params["w1"]) + params["b1"], 0.0)
    mu = adj @ (h1 @ params["w2"]) + params["b2"]
    logvar = adj @ (h1 @ params["w3"]) + params["b3"]
    z = mu
    return z @ z.T, mu, logvar, z


if __name__ == "__main__":
    # Small synthetic graph consistent with the module's __init__ signature.
    N = 128            # number of nodes
    in_features = 48
    hidden_dim = 32
    out_features = 16

    key = jax.random.PRNGKey(0)
    k_x, k_adj, k_p = jax.random.split(key, 3)

    x = jax.random.normal(k_x, (N, in_features), jnp.float32)

    # Symmetric, row-normalized adjacency with self loops (dense stand-in for
    # the sparse adj used by torch.sparse.mm).
    a = (jax.random.uniform(k_adj, (N, N)) < 0.05).astype(jnp.float32)
    a = jnp.maximum(a, a.T) + jnp.eye(N, dtype=jnp.float32)
    deg = jnp.sum(a, axis=1, keepdims=True)
    adj = a / deg

    params = init_params(k_p, in_features, hidden_dim, out_features)
    padded = prepare_params(params)   # one-time static padding / W2|W3 fusion

    recon, mu, logvar, z = gcn_nomal_forward(x, adj, padded, out_features)
    jax.block_until_ready((recon, mu, logvar, z))

    recon_r, mu_r, logvar_r, z_r = _reference(x, adj, params)
    assert recon.shape == (N, N)
    assert mu.shape == (N, out_features)
    assert logvar.shape == (N, out_features)
    assert z.shape == (N, out_features)
    assert jnp.allclose(mu, mu_r, atol=1e-4, rtol=1e-4)
    assert jnp.allclose(logvar, logvar_r, atol=1e-4, rtol=1e-4)
    assert jnp.allclose(z, z_r, atol=1e-4, rtol=1e-4)
    assert jnp.allclose(recon, recon_r, atol=1e-3, rtol=1e-3)

    print("KERNEL_OK")
</pallas_src>

<mosaic_0001>
module attributes {stable_mosaic.version = 11 : i64} {
  func.func @_fused_gcn_kernel(%arg0: i32, %arg1: memref<128x48xf32, #tpu.memory_space<vmem>>, %arg2: memref<128x128xf32, #tpu.memory_space<vmem>>, %arg3: memref<48x32xf32, #tpu.memory_space<vmem>>, %arg4: memref<1x32xf32, #tpu.memory_space<vmem>>, %arg5: memref<32x256xf32, #tpu.memory_space<vmem>>, %arg6: memref<1x256xf32, #tpu.memory_space<vmem>>, %arg7: memref<128x128xf32, #tpu.memory_space<vmem>>, %arg8: memref<128x128xf32, #tpu.memory_space<vmem>>, %arg9: memref<128x128xf32, #tpu.memory_space<vmem>>) attributes {dimension_semantics = [#tpu.dimension_semantics<arbitrary>], iteration_bounds = array<i64: 1>, scalar_prefetch = 0 : i64, scratch_operands = 0 : i64, tpu.core_type = #tpu.core_type<tc>, window_params = [{pipeline_mode = #tpu.pipeline_mode<synchronous>, transform_indices = @transform_0, window_bounds = array<i64: 128, 48>}, {pipeline_mode = #tpu.pipeline_mode<synchronous>, transform_indices = @transform_1, window_bounds = array<i64: 128, 128>}, {pipeline_mode = #tpu.pipeline_mode<synchronous>, transform_indices = @transform_2, window_bounds = array<i64: 48, 32>}, {pipeline_mode = #tpu.pipeline_mode<synchronous>, transform_indices = @transform_3, window_bounds = array<i64: 1, 32>}, {pipeline_mode = #tpu.pipeline_mode<synchronous>, transform_indices = @transform_4, window_bounds = array<i64: 32, 256>}, {pipeline_mode = #tpu.pipeline_mode<synchronous>, transform_indices = @transform_5, window_bounds = array<i64: 1, 256>}, {pipeline_mode = #tpu.pipeline_mode<synchronous>, transform_indices = @transform_6, window_bounds = array<i64: 128, 128>}, {pipeline_mode = #tpu.pipeline_mode<synchronous>, transform_indices = @transform_7, window_bounds = array<i64: 128, 128>}, {pipeline_mode = #tpu.pipeline_mode<synchronous>, transform_indices = @transform_8, window_bounds = array<i64: 128, 128>}]} {
    %c0 = arith.constant 0 : index
    %c0_0 = arith.constant 0 : index
    %0 = vector.load %arg2[%c0, %c0_0] : memref<128x128xf32, #tpu.memory_space<vmem>>, vector<128x128xf32>
    %c0_1 = arith.constant 0 : index
    %c0_2 = arith.constant 0 : index
    %1 = vector.load %arg1[%c0_1, %c0_2] : memref<128x48xf32, #tpu.memory_space<vmem>>, vector<128x48xf32>
    %c0_3 = arith.constant 0 : index
    %c0_4 = arith.constant 0 : index
    %2 = vector.load %arg3[%c0_3, %c0_4] : memref<48x32xf32, #tpu.memory_space<vmem>>, vector<48x32xf32>
    %cst = arith.constant dense<0.000000e+00> : vector<128x32xf32>
    %3 = tpu.matmul %1, %2, %cst {dimension_numbers = #tpu.dot_dimension_numbers<[1], [0], [0], [1], [0, 0, 1, 1], [], []>} : vector<128x48xf32>, vector<48x32xf32>, vector<128x32xf32> -> vector<128x32xf32>
    %cst_5 = arith.constant dense<0.000000e+00> : vector<128x32xf32>
    %4 = tpu.matmul %0, %3, %cst_5 {dimension_numbers = #tpu.dot_dimension_numbers<[1], [0], [0], [1], [0, 0, 1, 1], [], []>} : vector<128x128xf32>, vector<128x32xf32>, vector<128x32xf32> -> vector<128x32xf32>
    %c0_6 = arith.constant 0 : index
    %c0_7 = arith.constant 0 : index
    %5 = vector.load %arg4[%c0_6, %c0_7] : memref<1x32xf32, #tpu.memory_space<vmem>>, vector<1x32xf32>
    %6 = vector.broadcast %5 : vector<1x32xf32> to vector<128x32xf32>
    %7 = arith.addf %4, %6 : vector<128x32xf32>
    %cst_8 = arith.constant 0.000000e+00 : f32
    %8 = vector.broadcast %cst_8 : f32 to vector<128x32xf32>
    %9 = arith.maximumf %7, %8 : vector<128x32xf32>
    %c0_9 = arith.constant 0 : index
    %c0_10 = arith.constant 0 : index
    %10 = vector.load %arg5[%c0_9, %c0_10] : memref<32x256xf32, #tpu.memory_space<vmem>>, vector<32x256xf32>
    %cst_11 = arith.constant dense<0.000000e+00> : vector<128x256xf32>
    %11 = tpu.matmul %9, %10, %cst_11 {dimension_numbers = #tpu.dot_dimension_numbers<[1], [0], [0], [1], [0, 0, 1, 1], [], []>} : vector<128x32xf32>, vector<32x256xf32>, vector<128x256xf32> -> vector<128x256xf32>
    %cst_12 = arith.constant dense<0.000000e+00> : vector<128x256xf32>
    %12 = tpu.matmul %0, %11, %cst_12 {dimension_numbers = #tpu.dot_dimension_numbers<[1], [0], [0], [1], [0, 0, 1, 1], [], []>} : vector<128x128xf32>, vector<128x256xf32>, vector<128x256xf32> -> vector<128x256xf32>
    %c0_13 = arith.constant 0 : index
    %c0_14 = arith.constant 0 : index
    %13 = vector.load %arg6[%c0_13, %c0_14] : memref<1x256xf32, #tpu.memory_space<vmem>>, vector<1x256xf32>
    %14 = vector.broadcast %13 : vector<1x256xf32> to vector<128x256xf32>
    %15 = arith.addf %12, %14 : vector<128x256xf32>
    %16 = vector.extract_strided_slice %15 {offsets = [0, 0], sizes = [128, 128], strides = [1, 1]} : vector<128x256xf32> to vector<128x128xf32>
    %17 = vector.extract_strided_slice %15 {offsets = [0, 128], sizes = [128, 128], strides = [1, 1]} : vector<128x256xf32> to vector<128x128xf32>
    %c0_15 = arith.constant 0 : index
    %c0_16 = arith.constant 0 : index
    %18 = vector.load %arg8[%c0_15, %c0_16] : memref<128x128xf32, #tpu.memory_space<vmem>>, vector<128x128xf32>
    tpu.vector_store %arg8[%c0_15, %c0_16], %16 {strides = array<i32>} : memref<128x128xf32, #tpu.memory_space<vmem>>, vector<128x128xf32>,
    %c0_17 = arith.constant 0 : index
    %c0_18 = arith.constant 0 : index
    %19 = vector.load %arg9[%c0_17, %c0_18] : memref<128x128xf32, #tpu.memory_space<vmem>>, vector<128x128xf32>
    tpu.vector_store %arg9[%c0_17, %c0_18], %17 {strides = array<i32>} : memref<128x128xf32, #tpu.memory_space<vmem>>, vector<128x128xf32>,
    %cst_19 = arith.constant dense<0.000000e+00> : vector<128x128xf32>
    %20 = tpu.matmul %16, %16, %cst_19 {dimension_numbers = #tpu.dot_dimension_numbers<[1], [1], [0], [0], [0, 0, 1, 0], [], []>} : vector<128x128xf32>, vector<128x128xf32>, vector<128x128xf32> -> vector<128x128xf32>
    %c0_20 = arith.constant 0 : index
    %c0_21 = arith.constant 0 : index
    %21 = vector.load %arg7[%c0_20, %c0_21] : memref<128x128xf32, #tpu.memory_space<vmem>>, vector<128x128xf32>
    tpu.vector_store %arg7[%c0_20, %c0_21], %20 {strides = array<i32>} : memref<128x128xf32, #tpu.memory_space<vmem>>, vector<128x128xf32>,
    return
  }
  func.func @transform_0(%arg0: i32) -> (i32, i32) {
    %c0_i32 = arith.constant 0 : i32
    %c0_i32_0 = arith.constant 0 : i32
    %c0_i32_1 = arith.constant 0 : i32
    return %c0_i32, %c0_i32_0 : i32, i32
  }
  func.func @transform_1(%arg0: i32) -> (i32, i32) {
    %c0_i32 = arith.constant 0 : i32
    %c0_i32_0 = arith.constant 0 : i32
    %c0_i32_1 = arith.constant 0 : i32
    return %c0_i32, %c0_i32_0 : i32, i32
  }
  func.func @transform_2(%arg0: i32) -> (i32, i32) {
    %c0_i32 = arith.constant 0 : i32
    %c0_i32_0 = arith.constant 0 : i32
    %c0_i32_1 = arith.constant 0 : i32
    return %c0_i32, %c0_i32_0 : i32, i32
  }
  func.func @transform_3(%arg0: i32) -> (i32, i32) {
    %c0_i32 = arith.constant 0 : i32
    %c0_i32_0 = arith.constant 0 : i32
    %c0_i32_1 = arith.constant 0 : i32
    return %c0_i32, %c0_i32_0 : i32, i32
  }
  func.func @transform_4(%arg0: i32) -> (i32, i32) {
    %c0_i32 = arith.constant 0 : i32
    %c0_i32_0 = arith.constant 0 : i32
    %c0_i32_1 = arith.constant 0 : i32
    return %c0_i32, %c0_i32_0 : i32, i32
  }
  func.func @transform_5(%arg0: i32) -> (i32, i32) {
    %c0_i32 = arith.constant 0 : i32
    %c0_i32_0 = arith.constant 0 : i32
    %c0_i32_1 = arith.constant 0 : i32
    return %c0_i32, %c0_i32_0 : i32, i32
  }
  func.func @transform_6(%arg0: i32) -> (i32, i32) {
    %c0_i32 = arith.constant 0 : i32
    %c0_i32_0 = arith.constant 0 : i32
    %c0_i32_1 = arith.constant 0 : i32
    return %c0_i32, %c0_i32_0 : i32, i32
  }
  func.func @transform_7(%arg0: i32) -> (i32, i32) {
    %c0_i32 = arith.constant 0 : i32
    %c0_i32_0 = arith.constant 0 : i32
    %c0_i32_1 = arith.constant 0 : i32
    return %c0_i32, %c0_i32_0 : i32, i32
  }
  func.func @transform_8(%arg0: i32) -> (i32, i32) {
    %c0_i32 = arith.constant 0 : i32
    %c0_i32_0 = arith.constant 0 : i32
    %c0_i32_1 = arith.constant 0 : i32
    return %c0_i32, %c0_i32_0 : i32, i32
  }
}

</mosaic_0001>

<bundles_post_ra>
// kernel: gcn_nomal_forward.1
= control target key start
LH: loop header
LB: loop body
LE: loop exit
PB: predicated region body
PF: predicated region fallthrough
CT: control target
= control target key end

     0   :  { %vm65_vm0 = vcmask 392192   ;;  %s1995_s0 = inlined_call_operand.vmem [shape: f32[128,48], index: 0, kind: input, shape index: {}]   ;;  %s1996_s1 = inlined_call_operand.vmem [shape: f32[128,128], index: 1, kind: input, shape index: {}]   ;;  %s1997_s2 = inlined_call_operand.vmem [shape: f32[48,32], index: 2, kind: input, shape index: {}]   ;;  %s1998_s3 = inlined_call_operand.vmem [shape: f32[1,32], index: 3, kind: input, shape index: {}]   ;;  %s1999_s4 = inlined_call_operand.vmem [shape: f32[32,256], index: 4, kind: input, shape index: {}]   ;;  %s2000_s5 = inlined_call_operand.vmem [shape: f32[1,256], index: 5, kind: input, shape index: {}]   ;;  %s2001_s6 = inlined_call_operand.hbm [shape: f32[128,128], index: 6, kind: output, shape index: {0}]   ;;  %s2002_s7 = inlined_call_operand.vmem [shape: f32[128,128], index: 7, kind: output, shape index: {1}]   ;;  %s2003_s8 = inlined_call_operand.vmem [shape: f32[128,128], index: 8, kind: output, shape index: {2}]  }
   0x1   :  { %v59_v0 = vld [vmem:[%s1997_s2] sm:$0xff]  ;;  %v60_v1 = vld [vmem:[%s1997_s2 + $0x8] sm:$0xff]  ;;  %v61_v2 = vld [vmem:[%s1997_s2 + $0x10] sm:$0xff] }
   0x2   :  { %v1302_v3 = vpack.c.bf16 %v60_v1, %v59_v0  ;;  %v62_v4 = vld [vmem:[%s1997_s2 + $0x18] sm:$0xff]  ;;  %v63_v6 = vld [vmem:[%s1997_s2 + $0x20] sm:$0xff]  ;;  %v64_v7 = vld [vmem:[%s1997_s2 + $0x28] sm:$0xff] }
   0x3   :  { %v1306_v5 = vpack.c.bf16 %v62_v4, %v61_v2  ;;  %v43_v8 = vld [vmem:[%s1995_s0] sm:$0xff]  ;;  %v1310_v9 = vpack.c.bf16 %v64_v7, %v63_v6 }
   0x4   :  { %1303 = vmatprep.subr.bf16.mxu0 %v1302_v3  ;;  %1166 = vmatprep.mubr.msk.f32.mxu0 %vm65_vm0, %v43_v8 }
   0x5   :  { %1305 = vmatpush3.bf16.msra.mxu0 %v1302_v3 }
   0x6   :  { %1307 = vmatprep.subr.bf16.mxu0 %v1306_v5 }
   0x7   :  { %14 = vsyncpa [#allocation3], 0  ;;  %v44_v10 = vld [vmem:[%s1995_s0 + $0x8] sm:$0xff]  ;;  %v45_v11 = vld [vmem:[%s1995_s0 + $0x10] sm:$0xff]  ;;  %vm435_vm1 = vcmask 261120  }
   0x8   :  { %v46_v12 = vld [vmem:[%s1995_s0 + $0x18] sm:$0xff]  ;;  %v47_v13 = vld [vmem:[%s1995_s0 + $0x20] sm:$0xff]  ;;  %v48_v14 = vld [vmem:[%s1995_s0 + $0x28] sm:$0xff] }
   0x9   :  { %1309 = vmatpush3.bf16.msra.mxu0 %v1306_v5  ;;  %v49_v15 = vld [vmem:[%s1995_s0 + $0x30] sm:$0xff]  ;;  %v50_v16 = vld [vmem:[%s1995_s0 + $0x38] sm:$0xff]  ;;  %v51_v17 = vld [vmem:[%s1995_s0 + $0x40] sm:$0xff] }
   0xa   :  { %1311 = vmatprep.subr.bf16.mxu0 %v1310_v9  ;;  %v52_v18 = vld [vmem:[%s1995_s0 + $0x48] sm:$0xff]  ;;  %v53_v19 = vld [vmem:[%s1995_s0 + $0x50] sm:$0xff]  ;;  %v54_v20 = vld [vmem:[%s1995_s0 + $0x58] sm:$0xff] }
   0xb   :  { %v55_v21 = vld [vmem:[%s1995_s0 + $0x60] sm:$0xff]  ;;  %v56_v22 = vld [vmem:[%s1995_s0 + $0x68] sm:$0xff]  ;;  %v57_v23 = vld [vmem:[%s1995_s0 + $0x70] sm:$0xff] }
   0xc   :  { %v58_v24 = vld [vmem:[%s1995_s0 + $0x78] sm:$0xff]  ;;  %v1596_v25 = vld [vmem:[%s1996_s1] sm:$0xff]  ;;  %v428_v26 = vld [vmem:[%s1999_s4 + $0x8] sm:$0xff] }
   0xd   :  { %1313 = vmatpush3.bf16.msra.mxu0 %v1310_v9  ;;  %1222 = vmatprep.mubr.f32.mxu1 %v1596_v25  ;;  %v430_v27 = vld [vmem:[%s1999_s4 + $0x18] sm:$0xff]  ;;  %v427_v28 = vld [vmem:[%s1999_s4] sm:$0xff]  ;;  %v429_v30 = vld [vmem:[%s1999_s4 + $0x10] sm:$0xff] }
   0xe   :  { %v1346_v29 = vpack.c.bf16 %v430_v27, %v428_v26  ;;  %v432_v31 = vld [vmem:[%s1999_s4 + $0x28] sm:$0xff]  ;;  %v434_v32 = vld [vmem:[%s1999_s4 + $0x38] sm:$0xff]  ;;  %v1348_v33 = vpack.c.bf16 %v429_v30, %v427_v28  ;;  %v431_v35 = vld [vmem:[%s1999_s4 + $0x20] sm:$0xff] }
   0xf   :  { %v1350_v34 = vpack.c.bf16 %v434_v32, %v432_v31  ;;  %v433_v36 = vld [vmem:[%s1999_s4 + $0x30] sm:$0xff]  ;;  %v1626_v62 = vld [vmem:[%s1996_s1 + $0x8] sm:$0xff]  ;;  %v1638_v0 = vld [vmem:[%s1996_s1 + $0x18] sm:$0xff] }
  0x10   :  { %1167 = vmatmul.mubr.msk.f32.vlgmr.msra.gmra.mrb[0].mxu0 %vm65_vm0, %v44_v10  ;;  %1347 = vmatprep.subr.bf16.mxu0 %v1346_v29  ;;  %v1352_v37 = vpack.c.bf16 %v433_v36, %v431_v35  ;;  %v1631_v63 = vld [vmem:[%s1996_s1 + $0x10] sm:$0xff]  ;;  %v1643_v1 = vld [vmem:[%s1996_s1 + $0x20] sm:$0xff]  ;;  %v1650_v2 = vld [vmem:[%s1996_s1 + $0x28] sm:$0xff] }
  0x11   :  { %1169 = vmatprep.mubr.msk.f32.mxu0 %vm65_vm0, %v45_v11  ;;  %1349 = vmatpush1.bf16.msra.mxu0 %v1348_v33  ;;  %v1655_v3 = vld [vmem:[%s1996_s1 + $0x30] sm:$0xff]  ;;  %v1662_v4 = vld [vmem:[%s1996_s1 + $0x38] sm:$0xff]  ;;  %v1667_v5 = vld [vmem:[%s1996_s1 + $0x40] sm:$0xff] }
  0x12   :  { %1351 = vmatprep.subr.bf16.mxu0 %v1350_v34  ;;  %v1674_v6 = vld [vmem:[%s1996_s1 + $0x48] sm:$0xff]  ;;  %v1679_v7 = vld [vmem:[%s1996_s1 + $0x50] sm:$0xff]  ;;  %v1686_v8 = vld [vmem:[%s1996_s1 + $0x58] sm:$0xff] }
  0x13   :  { %v1691_v9 = vld [vmem:[%s1996_s1 + $0x60] sm:$0xff]  ;;  %v1698_v10 = vld [vmem:[%s1996_s1 + $0x68] sm:$0xff]  ;;  %v1703_v11 = vld [vmem:[%s1996_s1 + $0x70] sm:$0xff] }
  0x14   :  { %1170 = vmatmul.mubr.msk.f32.gmra.mrb[2].mxu0 %vm65_vm0, %v46_v12  ;;  %v1710_v12 = vld [vmem:[%s1996_s1 + $0x78] sm:$0xff] }
  0x15   :  { %1172 = vmatprep.mubr.msk.f32.mxu0 %vm65_vm0, %v47_v13  ;;  %1353 = vmatpush1.bf16.msra.mxu0 %v1352_v37  ;;  %v1462_v13 = vmov 0.0  }
  0x18   :  { %1173 = vmatmul.mubr.msk.f32.gmra.mrb[4].mxu0 %vm65_vm0, %v48_v14  ;;  %v1718_v14 = vld [vmem:[%s1998_s3] ss:$0 sm:$0xff] }
  0x19   :  { %1175 = vmatprep.mubr.msk.f32.mxu0 %vm65_vm0, %v49_v15 }
  0x1c   :  { %1176 = vmatmul.mubr.msk.f32.gmra.mrb[6].mxu0 %vm65_vm0, %v50_v16 }
  0x1d   :  { %1178 = vmatprep.mubr.msk.f32.mxu0 %vm65_vm0, %v51_v17 }
  0x20   :  { %1179 = vmatmul.mubr.msk.f32.gmra.mrb[8].mxu0 %vm65_vm0, %v52_v18 }
  0x21   :  { %1181 = vmatprep.mubr.msk.f32.mxu0 %vm65_vm0, %v53_v19 }
  0x24   :  { %1182 = vmatmul.mubr.msk.f32.gmra.mrb[10].mxu0 %vm65_vm0, %v54_v20 }
  0x25   :  { %1184 = vmatprep.mubr.msk.f32.mxu0 %vm65_vm0, %v55_v21 }
  0x28   :  { %1185 = vmatmul.mubr.msk.f32.gmra.mrb[12].mxu0 %vm65_vm0, %v56_v22 }
  0x29   :  { %1187 = vmatprep.mubr.msk.f32.mxu0 %vm65_vm0, %v57_v23 }
  0x2c   :  { %1188 = vmatmul.mubr.msk.f32.gmra.mrb[14].mxu0 %vm65_vm0, %v58_v24 }
  0x2d   :  { %548 = vmatprep.mubr.f32.mxu0 %v1462_v13 }
  0xe3   :  { %v1168_v38 = vpop.f32.mrb[0].mxu0 }
  0xe4   :  { %v180_v39 = vpop.f32.mrb[1].mxu0 }
  0xe5   :  { %v1314_v40 = vpack.c.bf16 %v1168_v38, %v180_v39 }
  0xe7   :  { %v1171_v41 = vpop.f32.mrb[2].mxu0  ;;  %1315 = vmatprep.subr.bf16.mxu1 %v1314_v40 }
  0xe8   :  { %v190_v42 = vpop.f32.mrb[3].mxu0  ;;  %1317 = vmatpush3.bf16.msra.mxu1 %v1314_v40 }
  0xe9   :  { %v1318_v43 = vpack.c.bf16 %v1171_v41, %v190_v42 }
  0xeb   :  { %v1174_v44 = vpop.f32.mrb[4].mxu0  ;;  %1319 = vmatprep.subr.bf16.mxu1 %v1318_v43 }
  0xec   :  { %v200_v45 = vpop.f32.mrb[5].mxu0  ;;  %1321 = vmatpush3.bf16.msra.mxu1 %v1318_v43 }
  0xed   :  { %v1322_v46 = vpack.c.bf16 %v1174_v44, %v200_v45 }
  0xef   :  { %v1177_v47 = vpop.f32.mrb[6].mxu0  ;;  %1323 = vmatprep.subr.bf16.mxu1 %v1322_v46 }
  0xf0   :  { %v210_v48 = vpop.f32.mrb[7].mxu0  ;;  %1325 = vmatpush3.bf16.msra.mxu1 %v1322_v46 }
  0xf1   :  { %v1326_v49 = vpack.c.bf16 %v1177_v47, %v210_v48 }
  0xf3   :  { %v1180_v50 = vpop.f32.mrb[8].mxu0  ;;  %1327 = vmatprep.subr.bf16.mxu1 %v1326_v49 }
  0xf4   :  { %v220_v51 = vpop.f32.mrb[9].mxu0  ;;  %1329 = vmatpush3.bf16.msra.mxu1 %v1326_v49 }
  0xf5   :  { %v1330_v52 = vpack.c.bf16 %v1180_v50, %v220_v51 }
  0xf7   :  { %v1183_v53 = vpop.f32.mrb[10].mxu0  ;;  %1331 = vmatprep.subr.bf16.mxu1 %v1330_v52 }
  0xf8   :  { %v230_v54 = vpop.f32.mrb[11].mxu0  ;;  %1333 = vmatpush3.bf16.msra.mxu1 %v1330_v52 }
  0xf9   :  { %v1334_v55 = vpack.c.bf16 %v1183_v53, %v230_v54 }
  0xfb   :  { %v1186_v56 = vpop.f32.mrb[12].mxu0  ;;  %1335 = vmatprep.subr.bf16.mxu1 %v1334_v55 }
  0xfc   :  { %v240_v57 = vpop.f32.mrb[13].mxu0  ;;  %1337 = vmatpush3.bf16.msra.mxu1 %v1334_v55 }
  0xfd   :  { %v1338_v58 = vpack.c.bf16 %v1186_v56, %v240_v57 }
  0xff   :  { %v1189_v59 = vpop.f32.mrb[14].mxu0  ;;  %1339 = vmatprep.subr.bf16.mxu1 %v1338_v58 }
 0x100   :  { %v250_v60 = vpop.f32.mrb[15].mxu0  ;;  %1341 = vmatpush3.bf16.msra.mxu1 %v1338_v58 }
 0x101   :  { %v1342_v61 = vpack.c.bf16 %v1189_v59, %v250_v60 }
 0x103   :  { %1343 = vmatprep.subr.bf16.mxu1 %v1342_v61 }
 0x104   :  { %1345 = vmatpush3.bf16.msra.mxu1 %v1342_v61 }
 0x107   :  { %1223 = vmatmul.mubr.f32.vlgmr.msra.gmra.mrb[0].mxu1 %v1626_v62 }
 0x108   :  { %1225 = vmatprep.mubr.f32.mxu1 %v1631_v63 }
 0x10b   :  { %1226 = vmatmul.mubr.f32.gmra.mrb[2].mxu1 %v1638_v0 }
 0x10c   :  { %1228 = vmatprep.mubr.f32.mxu1 %v1643_v1 }
 0x10f   :  { %1229 = vmatmul.mubr.f32.gmra.mrb[4].mxu1 %v1650_v2 }
 0x110   :  { %1231 = vmatprep.mubr.f32.mxu1 %v1655_v3 }
 0x113   :  { %1232 = vmatmul.mubr.f32.gmra.mrb[6].mxu1 %v1662_v4 }
 0x114   :  { %1234 = vmatprep.mubr.f32.mxu1 %v1667_v5 }
 0x117   :  { %1235 = vmatmul.mubr.f32.gmra.mrb[8].mxu1 %v1674_v6 }
 0x118   :  { %1237 = vmatprep.mubr.f32.mxu1 %v1679_v7 }
 0x11b   :  { %1238 = vmatmul.mubr.f32.gmra.mrb[10].mxu1 %v1686_v8 }
 0x11c   :  { %1240 = vmatprep.mubr.f32.mxu1 %v1691_v9 }
 0x11f   :  { %1241 = vmatmul.mubr.f32.gmra.mrb[12].mxu1 %v1698_v10 }
 0x120   :  { %1243 = vmatprep.mubr.f32.mxu1 %v1703_v11 }
 0x123   :  { %1244 = vmatmul.mubr.f32.gmra.mrb[14].mxu1 %v1710_v12 }
 0x124   :  { %721 = vmatprep.mubr.f32.mxu1 %v1462_v13 }
 0x1da   :  { %v1224_v15 = vpop.f32.mrb[0].mxu1 }
 0x1db   :  { %v332_v16 = vpop.f32.mrb[1].mxu1  ;;  %v338_v18 = vadd.f32 %v1224_v15, %v1718_v14 }
 0x1dc   :  { %v333_v17 = vadd.f32 %v1718_v14, %v332_v16 }
 0x1dd   :  { %v412_v23 = vmax.f32 %v338_v18, 0.0 }
 0x1de   :  { %v411_v19 = vmax.f32 %v333_v17, 0.0  ;;  %v1227_v20 = vpop.f32.mrb[2].mxu1 }
 0x1df   :  { %v342_v21 = vpop.f32.mrb[3].mxu1  ;;  %v348_v28 = vadd.f32 %v1227_v20, %v1718_v14 }
 0x1e0   :  { %1052 = vmatmul.mubr.msk.f32.vlgmr.msra.gmra.mrb[16].mxu0 %vm435_vm1, %v411_v19  ;;  %v343_v22 = vadd.f32 %v1718_v14, %v342_v21 }
 0x1e1   :  { %554 = vmatprep.mubr.f32.mxu0 %v1462_v13  ;;  %v414_v32 = vmax.f32 %v348_v28, 0.0 }
 0x1e2   :  { %v1230_v24 = vpop.f32.mrb[4].mxu1  ;;  %v413_v27 = vmax.f32 %v343_v22, 0.0 }
 0x1e3   :  { %v352_v26 = vpop.f32.mrb[5].mxu1  ;;  %v358_v36 = vadd.f32 %v1230_v24, %v1718_v14 }
 0x1e4   :  { %1053 = vmatmul.mubr.msk.f32.gmra.mrb[18].mxu0 %vm435_vm1, %v412_v23  ;;  %v353_v31 = vadd.f32 %v1718_v14, %v352_v26 }
 0x1e5   :  { %560 = vmatprep.mubr.f32.mxu0 %v1462_v13  ;;  %v416_v40 = vmax.f32 %v358_v36, 0.0 }
 0x1e6   :  { %v1233_v29 = vpop.f32.mrb[6].mxu1  ;;  %v415_v35 = vmax.f32 %v353_v31, 0.0 }
 0x1e7   :  { %v362_v30 = vpop.f32.mrb[7].mxu1  ;;  %v368_v44 = vadd.f32 %v1233_v29, %v1718_v14 }
 0x1e8   :  { %1054 = vmatmul.mubr.msk.f32.gmra.mrb[20].mxu0 %vm435_vm1, %v413_v27  ;;  %v363_v39 = vadd.f32 %v1718_v14, %v362_v30 }
 0x1e9   :  { %566 = vmatprep.mubr.f32.mxu0 %v1462_v13  ;;  %v418_v48 = vmax.f32 %v368_v44, 0.0 }
 0x1ea   :  { %v1236_v33 = vpop.f32.mrb[8].mxu1  ;;  %v417_v43 = vmax.f32 %v363_v39, 0.0 }
 0x1eb   :  { %v372_v34 = vpop.f32.mrb[9].mxu1  ;;  %v378_v50 = vadd.f32 %v1236_v33, %v1718_v14 }
 0x1ec   :  { %1055 = vmatmul.mubr.msk.f32.gmra.mrb[22].mxu0 %vm435_vm1, %v414_v32  ;;  %v373_v47 = vadd.f32 %v1718_v14, %v372_v34 }
 0x1ed   :  { %572 = vmatprep.mubr.f32.mxu0 %v1462_v13  ;;  %v420_v52 = vmax.f32 %v378_v50, 0.0 }
 0x1ee   :  { %v1239_v37 = vpop.f32.mrb[10].mxu1  ;;  %v419_v49 = vmax.f32 %v373_v47, 0.0 }
 0x1ef   :  { %v382_v38 = vpop.f32.mrb[11].mxu1  ;;  %v388_v54 = vadd.f32 %v1239_v37, %v1718_v14 }
 0x1f0   :  { %1056 = vmatmul.mubr.msk.f32.gmra.mrb[24].mxu0 %vm435_vm1, %v415_v35  ;;  %v383_v51 = vadd.f32 %v1718_v14, %v382_v38 }
 0x1f1   :  { %578 = vmatprep.mubr.f32.mxu0 %v1462_v13  ;;  %v422_v56 = vmax.f32 %v388_v54, 0.0 }
 0x1f2   :  { %v1242_v41 = vpop.f32.mrb[12].mxu1  ;;  %v421_v53 = vmax.f32 %v383_v51, 0.0 }
 0x1f3   :  { %v392_v42 = vpop.f32.mrb[13].mxu1  ;;  %v398_v58 = vadd.f32 %v1242_v41, %v1718_v14 }
 0x1f4   :  { %1057 = vmatmul.mubr.msk.f32.gmra.mrb[26].mxu0 %vm435_vm1, %v416_v40  ;;  %v393_v55 = vadd.f32 %v1718_v14, %v392_v42 }
 0x1f5   :  { %584 = vmatprep.mubr.f32.mxu0 %v1462_v13  ;;  %v424_v60 = vmax.f32 %v398_v58, 0.0 }
 0x1f6   :  { %v1245_v45 = vpop.f32.mrb[14].mxu1  ;;  %v423_v57 = vmax.f32 %v393_v55, 0.0 }
 0x1f7   :  { %v402_v46 = vpop.f32.mrb[15].mxu1  ;;  %v408_v15 = vadd.f32 %v1245_v45, %v1718_v14 }
 0x1f8   :  { %1058 = vmatmul.mubr.msk.f32.gmra.mrb[28].mxu0 %vm435_vm1, %v417_v43  ;;  %v403_v59 = vadd.f32 %v1718_v14, %v402_v46 }
 0x1f9   :  { %590 = vmatprep.mubr.f32.mxu0 %v1462_v13  ;;  %v426_v16 = vmax.f32 %v408_v15, 0.0 }
 0x1fa   :  { %v425_v61 = vmax.f32 %v403_v59, 0.0 }
 0x1fc   :  { %1059 = vmatmul.mubr.msk.f32.gmra.mrb[30].mxu0 %vm435_vm1, %v418_v48 }
 0x1fd   :  { %596 = vmatprep.mubr.f32.mxu0 %v1462_v13 }
 0x200   :  { %1060 = vmatmul.mubr.msk.f32.gmra.mrb[32].mxu0 %vm435_vm1, %v419_v49 }
 0x201   :  { %602 = vmatprep.mubr.f32.mxu0 %v1462_v13 }
 0x204   :  { %1061 = vmatmul.mubr.msk.f32.gmra.mrb[34].mxu0 %vm435_vm1, %v420_v52 }
 0x205   :  { %608 = vmatprep.mubr.f32.mxu0 %v1462_v13 }
 0x208   :  { %1062 = vmatmul.mubr.msk.f32.gmra.mrb[36].mxu0 %vm435_vm1, %v421_v53 }
 0x209   :  { %614 = vmatprep.mubr.f32.mxu0 %v1462_v13 }
 0x20c   :  { %1063 = vmatmul.mubr.msk.f32.gmra.mrb[38].mxu0 %vm435_vm1, %v422_v56 }
 0x20d   :  { %620 = vmatprep.mubr.f32.mxu0 %v1462_v13 }
 0x210   :  { %1064 = vmatmul.mubr.msk.f32.gmra.mrb[40].mxu0 %vm435_vm1, %v423_v57 }
 0x211   :  { %626 = vmatprep.mubr.f32.mxu0 %v1462_v13 }
 0x214   :  { %1065 = vmatmul.mubr.msk.f32.gmra.mrb[42].mxu0 %vm435_vm1, %v424_v60 }
 0x215   :  { %632 = vmatprep.mubr.f32.mxu0 %v1462_v13 }
 0x218   :  { %1066 = vmatmul.mubr.msk.f32.gmra.mrb[44].mxu0 %vm435_vm1, %v425_v61 }
 0x219   :  { %638 = vmatprep.mubr.f32.mxu0 %v1462_v13 }
 0x21c   :  { %1067 = vmatmul.mubr.msk.f32.gmra.mrb[46].mxu0 %vm435_vm1, %v426_v16 }
 0x2b3   :  { %v550_v17 = vpop.f32.mrb[16].mxu0 }
 0x2b4   :  { %v552_v18 = vpop.f32.mrb[17].mxu0 }
 0x2b7   :  { %v556_v19 = vpop.f32.mrb[18].mxu0 }
 0x2b8   :  { %v1356_v20 = vpack.c.bf16 %v556_v19, %v550_v17  ;;  %v558_v21 = vpop.f32.mrb[19].mxu0 }
 0x2b9   :  { %v1354_v22 = vpack.c.bf16 %v558_v21, %v552_v18 }
 0x2bb   :  { %v562_v23 = vpop.f32.mrb[20].mxu0  ;;  %1355 = vmatprep.subr.bf16.mxu1 %v1354_v22 }
 0x2bc   :  { %v564_v24 = vpop.f32.mrb[21].mxu0  ;;  %1357 = vmatpush1.bf16.msra.mxu1 %v1356_v20 }
 0x2bf   :  { %v568_v26 = vpop.f32.mrb[22].mxu0 }
 0x2c0   :  { %v1360_v27 = vpack.c.bf16 %v568_v26, %v562_v23  ;;  %v570_v14 = vpop.f32.mrb[23].mxu0 }
 0x2c1   :  { %v1358_v28 = vpack.c.bf16 %v570_v14, %v564_v24 }
 0x2c3   :  { %v574_v29 = vpop.f32.mrb[24].mxu0  ;;  %1359 = vmatprep.subr.bf16.mxu1 %v1358_v28 }
 0x2c4   :  { %v576_v30 = vpop.f32.mrb[25].mxu0  ;;  %1361 = vmatpush1.bf16.msra.mxu1 %v1360_v27 }
 0x2c7   :  { %v580_v31 = vpop.f32.mrb[26].mxu0 }
 0x2c8   :  { %v1364_v32 = vpack.c.bf16 %v580_v31, %v574_v29  ;;  %v582_v33 = vpop.f32.mrb[27].mxu0 }
 0x2c9   :  { %v1362_v34 = vpack.c.bf16 %v582_v33, %v576_v30 }
 0x2cb   :  { %v586_v35 = vpop.f32.mrb[28].mxu0  ;;  %1363 = vmatprep.subr.bf16.mxu1 %v1362_v34 }
 0x2cc   :  { %v588_v36 = vpop.f32.mrb[29].mxu0  ;;  %1365 = vmatpush1.bf16.msra.mxu1 %v1364_v32 }
 0x2cf   :  { %v592_v37 = vpop.f32.mrb[30].mxu0 }
 0x2d0   :  { %v1368_v38 = vpack.c.bf16 %v592_v37, %v586_v35  ;;  %v594_v39 = vpop.f32.mrb[31].mxu0 }
 0x2d1   :  { %v1366_v40 = vpack.c.bf16 %v594_v39, %v588_v36 }
 0x2d3   :  { %v598_v41 = vpop.f32.mrb[32].mxu0  ;;  %1367 = vmatprep.subr.bf16.mxu1 %v1366_v40 }
 0x2d4   :  { %v600_v42 = vpop.f32.mrb[33].mxu0  ;;  %1369 = vmatpush1.bf16.msra.mxu1 %v1368_v38 }
 0x2d7   :  { %v604_v43 = vpop.f32.mrb[34].mxu0 }
 0x2d8   :  { %v1372_v44 = vpack.c.bf16 %v604_v43, %v598_v41  ;;  %v606_v45 = vpop.f32.mrb[35].mxu0 }
 0x2d9   :  { %v1370_v46 = vpack.c.bf16 %v606_v45, %v600_v42 }
 0x2db   :  { %v610_v47 = vpop.f32.mrb[36].mxu0  ;;  %1371 = vmatprep.subr.bf16.mxu1 %v1370_v46 }
 0x2dc   :  { %v612_v48 = vpop.f32.mrb[37].mxu0  ;;  %1373 = vmatpush1.bf16.msra.mxu1 %v1372_v44 }
 0x2df   :  { %v616_v49 = vpop.f32.mrb[38].mxu0 }
 0x2e0   :  { %v1376_v50 = vpack.c.bf16 %v616_v49, %v610_v47  ;;  %v618_v51 = vpop.f32.mrb[39].mxu0 }
 0x2e1   :  { %v1374_v52 = vpack.c.bf16 %v618_v51, %v612_v48 }
 0x2e3   :  { %v622_v53 = vpop.f32.mrb[40].mxu0  ;;  %1375 = vmatprep.subr.bf16.mxu1 %v1374_v52 }
 0x2e4   :  { %v624_v54 = vpop.f32.mrb[41].mxu0  ;;  %1377 = vmatpush1.bf16.msra.mxu1 %v1376_v50 }
 0x2e7   :  { %v628_v55 = vpop.f32.mrb[42].mxu0 }
 0x2e8   :  { %v1380_v56 = vpack.c.bf16 %v628_v55, %v622_v53  ;;  %v630_v57 = vpop.f32.mrb[43].mxu0 }
 0x2e9   :  { %v1378_v58 = vpack.c.bf16 %v630_v57, %v624_v54 }
 0x2eb   :  { %v634_v59 = vpop.f32.mrb[44].mxu0  ;;  %1379 = vmatprep.subr.bf16.mxu1 %v1378_v58 }
 0x2ec   :  { %v636_v60 = vpop.f32.mrb[45].mxu0  ;;  %1381 = vmatpush1.bf16.msra.mxu1 %v1380_v56 }
 0x2ef   :  { %v640_v61 = vpop.f32.mrb[46].mxu0 }
 0x2f0   :  { %v1384_v15 = vpack.c.bf16 %v640_v61, %v634_v59  ;;  %v642_v16 = vpop.f32.mrb[47].mxu0 }
 0x2f1   :  { %v1382_v17 = vpack.c.bf16 %v642_v16, %v636_v60 }
 0x2f3   :  { %1383 = vmatprep.subr.bf16.mxu1 %v1382_v17 }
 0x2f4   :  { %1385 = vmatpush1.bf16.msra.mxu1 %v1384_v15 }
 0x2f7   :  { %722 = vmatmul.mubr.f32.vlgmr.msra.gmra.mrb[16].mxu1 %v1596_v25  ;;  %v647_v25 = vlaneseq }
 0x2f8   :  { %727 = vmatprep.mubr.f32.mxu1 %v1462_v13 }
 0x2fb   :  { %728 = vmatmul.mubr.f32.gmra.mrb[18].mxu1 %v1626_v62  ;;  %v648_v62 = vshrl.u32 %v647_v25, 7 }
 0x2fc   :  { %733 = vmatprep.mubr.f32.mxu1 %v1462_v13 }
 0x2ff   :  { %734 = vmatmul.mubr.f32.gmra.mrb[20].mxu1 %v1631_v63  ;;  %v649_v63 = vsub.s32 0, %v648_v62 }
 0x300   :  { %739 = vmatprep.mubr.f32.mxu1 %v1462_v13 }
 0x303   :  { %740 = vmatmul.mubr.f32.gmra.mrb[22].mxu1 %v1638_v0  ;;  %v645_v0 = vld [vmem:[%s2000_s5] sm:$0x3] }
 0x304   :  { %745 = vmatprep.mubr.f32.mxu1 %v1462_v13 }
 0x307   :  { %746 = vmatmul.mubr.f32.gmra.mrb[24].mxu1 %v1643_v1  ;;  %v653_v1 = vsub.s32 1, %v648_v62 }
 0x308   :  { %751 = vmatprep.mubr.f32.mxu1 %v1462_v13 }
 0x30b   :  { %752 = vmatmul.mubr.f32.gmra.mrb[26].mxu1 %v1650_v2  ;;  %v1801_v2 = vrot.slane %v645_v0, %v649_v63 }
 0x30c   :  { %757 = vmatprep.mubr.f32.mxu1 %v1462_v13 }
 0x30f   :  { %758 = vmatmul.mubr.f32.gmra.mrb[28].mxu1 %v1655_v3  ;;  %v1803_v3 = vrot.slane %v645_v0, %v653_v1 }
 0x310   :  { %763 = vmatprep.mubr.f32.mxu1 %v1462_v13 }
 0x313   :  { %764 = vmatmul.mubr.f32.gmra.mrb[30].mxu1 %v1662_v4 }
 0x314   :  { %769 = vmatprep.mubr.f32.mxu1 %v1462_v13 }
 0x317   :  { %770 = vmatmul.mubr.f32.gmra.mrb[32].mxu1 %v1667_v5 }
 0x318   :  { %775 = vmatprep.mubr.f32.mxu1 %v1462_v13 }
 0x31b   :  { %776 = vmatmul.mubr.f32.gmra.mrb[34].mxu1 %v1674_v6 }
 0x31c   :  { %781 = vmatprep.mubr.f32.mxu1 %v1462_v13 }
 0x31f   :  { %782 = vmatmul.mubr.f32.gmra.mrb[36].mxu1 %v1679_v7 }
 0x320   :  { %787 = vmatprep.mubr.f32.mxu1 %v1462_v13 }
 0x323   :  { %788 = vmatmul.mubr.f32.gmra.mrb[38].mxu1 %v1686_v8 }
 0x324   :  { %793 = vmatprep.mubr.f32.mxu1 %v1462_v13 }
 0x327   :  { %794 = vmatmul.mubr.f32.gmra.mrb[40].mxu1 %v1691_v9 }
 0x328   :  { %799 = vmatprep.mubr.f32.mxu1 %v1462_v13 }
 0x32b   :  { %800 = vmatmul.mubr.f32.gmra.mrb[42].mxu1 %v1698_v10 }
 0x32c   :  { %805 = vmatprep.mubr.f32.mxu1 %v1462_v13 }
 0x32f   :  { %806 = vmatmul.mubr.f32.gmra.mrb[44].mxu1 %v1703_v11 }
 0x330   :  { %811 = vmatprep.mubr.f32.mxu1 %v1462_v13 }
 0x333   :  { %812 = vmatmul.mubr.f32.gmra.mrb[46].mxu1 %v1710_v12 }
 0x3ca   :  { %v723_v4 = vpop.f32.mrb[16].mxu1 }
 0x3cb   :  { %v724_v5 = vadd.f32 %v723_v4, %v1801_v2  ;;  %v725_v6 = vpop.f32.mrb[17].mxu1 }
 0x3cc   :  { %v726_v7 = vadd.f32 %v725_v6, %v1803_v3 }
 0x3cd   :  { %818 = vst [vmem:[%s2002_s7] sm:$0xff] %v724_v5  ;;  %1278 = vmatprep.mubr.f32.mxu0 %v724_v5 }
 0x3ce   :  { %834 = vst [vmem:[%s2003_s8] sm:$0xff] %v726_v7  ;;  %v729_v8 = vpop.f32.mrb[18].mxu1 }
 0x3cf   :  { %v1814_v9 = vadd.f32 %v729_v8, %v1801_v2  ;;  %v731_v10 = vpop.f32.mrb[19].mxu1 }
 0x3d0   :  { %v732_v11 = vadd.f32 %v731_v10, %v1803_v3 }
 0x3d1   :  { %819 = vst [vmem:[%s2002_s7 + $0x8] sm:$0xff] %v1814_v9  ;;  %v1386_v12 = vpack.c.bf16 %v1814_v9, %v724_v5 }
 0x3d2   :  { %835 = vst [vmem:[%s2003_s8 + $0x8] sm:$0xff] %v732_v11  ;;  %v735_v13 = vpop.f32.mrb[20].mxu1 }
 0x3d3   :  { %v1826_v18 = vadd.f32 %v735_v13, %v1801_v2  ;;  %v737_v19 = vpop.f32.mrb[21].mxu1  ;;  %1387 = vmatprep.subr.bf16.mxu0 %v1386_v12  ;;  %1418 = vmatprep.subr.bf16.mxu1 %v1386_v12 }
 0x3d4   :  { %v738_v20 = vadd.f32 %v737_v19, %v1803_v3  ;;  %1389 = vmatpush3.bf16.xpose.msra.mxu0 %v1386_v12  ;;  %1426 = vmatpush3.bf16.xpose.msra.mxu1 %v1386_v12 }
 0x3d5   :  { %820 = vst [vmem:[%s2002_s7 + $0x10] sm:$0xff] %v1826_v18 }
 0x3d6   :  { %836 = vst [vmem:[%s2003_s8 + $0x10] sm:$0xff] %v738_v20  ;;  %v741_v21 = vpop.f32.mrb[22].mxu1 }
 0x3d7   :  { %v1837_v22 = vadd.f32 %v741_v21, %v1801_v2  ;;  %v743_v23 = vpop.f32.mrb[23].mxu1 }
 0x3d8   :  { %v744_v24 = vadd.f32 %v743_v23, %v1803_v3 }
 0x3d9   :  { %821 = vst [vmem:[%s2002_s7 + $0x18] sm:$0xff] %v1837_v22  ;;  %v1390_v26 = vpack.c.bf16 %v1837_v22, %v1826_v18 }
 0x3da   :  { %837 = vst [vmem:[%s2003_s8 + $0x18] sm:$0xff] %v744_v24  ;;  %v747_v27 = vpop.f32.mrb[24].mxu1 }
 0x3db   :  { %v1850_v14 = vadd.f32 %v747_v27, %v1801_v2  ;;  %v749_v28 = vpop.f32.mrb[25].mxu1  ;;  %1391 = vmatprep.subr.bf16.mxu0 %v1390_v26  ;;  %1419 = vmatprep.subr.bf16.mxu1 %v1390_v26 }
 0x3dc   :  { %v750_v29 = vadd.f32 %v749_v28, %v1803_v3  ;;  %1393 = vmatpush3.bf16.xpose.msra.mxu0 %v1390_v26  ;;  %1427 = vmatpush3.bf16.xpose.msra.mxu1 %v1390_v26 }
 0x3dd   :  { %822 = vst [vmem:[%s2002_s7 + $0x20] sm:$0xff] %v1850_v14 }
 0x3de   :  { %838 = vst [vmem:[%s2003_s8 + $0x20] sm:$0xff] %v750_v29  ;;  %v753_v30 = vpop.f32.mrb[26].mxu1 }
 0x3df   :  { %v1861_v31 = vadd.f32 %v753_v30, %v1801_v2  ;;  %v755_v32 = vpop.f32.mrb[27].mxu1 }
 0x3e0   :  { %v756_v33 = vadd.f32 %v755_v32, %v1803_v3 }
 0x3e1   :  { %823 = vst [vmem:[%s2002_s7 + $0x28] sm:$0xff] %v1861_v31  ;;  %v1394_v34 = vpack.c.bf16 %v1861_v31, %v1850_v14 }
 0x3e2   :  { %839 = vst [vmem:[%s2003_s8 + $0x28] sm:$0xff] %v756_v33  ;;  %v759_v35 = vpop.f32.mrb[28].mxu1 }
 0x3e3   :  { %v1874_v36 = vadd.f32 %v759_v35, %v1801_v2  ;;  %v761_v37 = vpop.f32.mrb[29].mxu1  ;;  %1395 = vmatprep.subr.bf16.mxu0 %v1394_v34  ;;  %1420 = vmatprep.subr.bf16.mxu1 %v1394_v34 }
 0x3e4   :  { %v762_v38 = vadd.f32 %v761_v37, %v1803_v3  ;;  %1397 = vmatpush3.bf16.xpose.msra.mxu0 %v1394_v34  ;;  %1428 = vmatpush3.bf16.xpose.msra.mxu1 %v1394_v34 }
 0x3e5   :  { %824 = vst [vmem:[%s2002_s7 + $0x30] sm:$0xff] %v1874_v36 }
 0x3e6   :  { %840 = vst [vmem:[%s2003_s8 + $0x30] sm:$0xff] %v762_v38  ;;  %v765_v39 = vpop.f32.mrb[30].mxu1 }
 0x3e7   :  { %v1885_v40 = vadd.f32 %v765_v39, %v1801_v2  ;;  %v767_v41 = vpop.f32.mrb[31].mxu1 }
 0x3e8   :  { %v768_v42 = vadd.f32 %v767_v41, %v1803_v3 }
 0x3e9   :  { %825 = vst [vmem:[%s2002_s7 + $0x38] sm:$0xff] %v1885_v40  ;;  %v1398_v43 = vpack.c.bf16 %v1885_v40, %v1874_v36 }
 0x3ea   :  { %841 = vst [vmem:[%s2003_s8 + $0x38] sm:$0xff] %v768_v42  ;;  %v771_v44 = vpop.f32.mrb[32].mxu1 }
 0x3eb   :  { %v1898_v45 = vadd.f32 %v771_v44, %v1801_v2  ;;  %v773_v46 = vpop.f32.mrb[33].mxu1  ;;  %1399 = vmatprep.subr.bf16.mxu0 %v1398_v43  ;;  %1421 = vmatprep.subr.bf16.mxu1 %v1398_v43 }
 0x3ec   :  { %v774_v47 = vadd.f32 %v773_v46, %v1803_v3  ;;  %1401 = vmatpush3.bf16.xpose.msra.mxu0 %v1398_v43  ;;  %1429 = vmatpush3.bf16.xpose.msra.mxu1 %v1398_v43 }
 0x3ed   :  { %826 = vst [vmem:[%s2002_s7 + $0x40] sm:$0xff] %v1898_v45 }
 0x3ee   :  { %842 = vst [vmem:[%s2003_s8 + $0x40] sm:$0xff] %v774_v47  ;;  %v777_v48 = vpop.f32.mrb[34].mxu1 }
 0x3ef   :  { %v1909_v49 = vadd.f32 %v777_v48, %v1801_v2  ;;  %v779_v50 = vpop.f32.mrb[35].mxu1 }
 0x3f0   :  { %v780_v51 = vadd.f32 %v779_v50, %v1803_v3 }
 0x3f1   :  { %827 = vst [vmem:[%s2002_s7 + $0x48] sm:$0xff] %v1909_v49  ;;  %v1402_v52 = vpack.c.bf16 %v1909_v49, %v1898_v45 }
 0x3f2   :  { %843 = vst [vmem:[%s2003_s8 + $0x48] sm:$0xff] %v780_v51  ;;  %v783_v53 = vpop.f32.mrb[36].mxu1 }
 0x3f3   :  { %v1922_v54 = vadd.f32 %v783_v53, %v1801_v2  ;;  %v785_v55 = vpop.f32.mrb[37].mxu1  ;;  %1403 = vmatprep.subr.bf16.mxu0 %v1402_v52  ;;  %1422 = vmatprep.subr.bf16.mxu1 %v1402_v52 }
 0x3f4   :  { %v786_v56 = vadd.f32 %v785_v55, %v1803_v3  ;;  %1405 = vmatpush3.bf16.xpose.msra.mxu0 %v1402_v52  ;;  %1430 = vmatpush3.bf16.xpose.msra.mxu1 %v1402_v52 }
 0x3f5   :  { %828 = vst [vmem:[%s2002_s7 + $0x50] sm:$0xff] %v1922_v54 }
 0x3f6   :  { %844 = vst [vmem:[%s2003_s8 + $0x50] sm:$0xff] %v786_v56  ;;  %v789_v57 = vpop.f32.mrb[38].mxu1 }
 0x3f7   :  { %v790_v58 = vadd.f32 %v789_v57, %v1801_v2  ;;  %v791_v59 = vpop.f32.mrb[39].mxu1 }
 0x3f8   :  { %v792_v60 = vadd.f32 %v791_v59, %v1803_v3 }
 0x3f9   :  { %829 = vst [vmem:[%s2002_s7 + $0x58] sm:$0xff] %v790_v58  ;;  %v1406_v61 = vpack.c.bf16 %v790_v58, %v1922_v54 }
 0x3fa   :  { %845 = vst [vmem:[%s2003_s8 + $0x58] sm:$0xff] %v792_v60  ;;  %v795_v15 = vpop.f32.mrb[40].mxu1 }
 0x3fb   :  { %v796_v16 = vadd.f32 %v795_v15, %v1801_v2  ;;  %v797_v17 = vpop.f32.mrb[41].mxu1  ;;  %1407 = vmatprep.subr.bf16.mxu0 %v1406_v61  ;;  %1423 = vmatprep.subr.bf16.mxu1 %v1406_v61 }
 0x3fc   :  { %v798_v25 = vadd.f32 %v797_v17, %v1803_v3  ;;  %1409 = vmatpush3.bf16.xpose.msra.mxu0 %v1406_v61  ;;  %1431 = vmatpush3.bf16.xpose.msra.mxu1 %v1406_v61 }
 0x3fd   :  { %830 = vst [vmem:[%s2002_s7 + $0x60] sm:$0xff] %v796_v16 }
 0x3fe   :  { %846 = vst [vmem:[%s2003_s8 + $0x60] sm:$0xff] %v798_v25  ;;  %v801_v62 = vpop.f32.mrb[42].mxu1 }
 0x3ff   :  { %v802_v63 = vadd.f32 %v801_v62, %v1801_v2  ;;  %v803_v0 = vpop.f32.mrb[43].mxu1 }
 0x400   :  { %v804_v1 = vadd.f32 %v803_v0, %v1803_v3 }
 0x401   :  { %831 = vst [vmem:[%s2002_s7 + $0x68] sm:$0xff] %v802_v63  ;;  %v1410_v4 = vpack.c.bf16 %v802_v63, %v796_v16 }
 0x402   :  { %847 = vst [vmem:[%s2003_s8 + $0x68] sm:$0xff] %v804_v1  ;;  %v807_v5 = vpop.f32.mrb[44].mxu1 }
 0x403   :  { %v808_v6 = vadd.f32 %v807_v5, %v1801_v2  ;;  %v809_v7 = vpop.f32.mrb[45].mxu1  ;;  %1411 = vmatprep.subr.bf16.mxu0 %v1410_v4  ;;  %1424 = vmatprep.subr.bf16.mxu1 %v1410_v4 }
 0x404   :  { %v810_v8 = vadd.f32 %v809_v7, %v1803_v3  ;;  %1413 = vmatpush3.bf16.xpose.msra.mxu0 %v1410_v4  ;;  %1432 = vmatpush3.bf16.xpose.msra.mxu1 %v1410_v4 }
 0x405   :  { %832 = vst [vmem:[%s2002_s7 + $0x70] sm:$0xff] %v808_v6  ;;  %1299 = vmatprep.mubr.f32.mxu1 %v808_v6 }
 0x406   :  { %848 = vst [vmem:[%s2003_s8 + $0x70] sm:$0xff] %v810_v8  ;;  %v813_v10 = vpop.f32.mrb[46].mxu1 }
 0x407   :  { %v814_v11 = vadd.f32 %v813_v10, %v1801_v2  ;;  %v815_v12 = vpop.f32.mrb[47].mxu1 }
 0x408   :  { %v816_v13 = vadd.f32 %v815_v12, %v1803_v3 }
 0x409   :  { %833 = vst [vmem:[%s2002_s7 + $0x78] sm:$0xff] %v814_v11  ;;  %v1414_v19 = vpack.c.bf16 %v814_v11, %v808_v6  ;;  %s1463_s7 = smov [#allocation2]  }
 0x40a   :  { %849 = vst [vmem:[%s2003_s8 + $0x78] sm:$0xff] %v816_v13  ;;  %s1016_s8 = sshll.u32 %s1463_s7, 4  ;;  %s1017_s8 = int_to_ptr.vmem [resolvable:$true] %s1016_s8 }
 0x40b   :  { %1415 = vmatprep.subr.bf16.mxu0 %v1414_v19  ;;  %1425 = vmatprep.subr.bf16.mxu1 %v1414_v19  ;;  %s1438_s10 = scalar_lea.vmem %s1017_s8, 2048  ;;  %p1443_p1 = scmp.lt.s32.totalorder %s1017_s8, %s1017_s8 }
 0x40c   :  { %1417 = vmatpush3.bf16.xpose.msra.mxu0 %v1414_v19  ;;  %1433 = vmatpush3.bf16.xpose.msra.mxu1 %v1414_v19  ;;  %p1439_p0 = scmp.ne.s32.totalorder %s1017_s8, %s1438_s10  ;;  %p1444_p2 = scmp.lt.s32.totalorder %s1438_s10, %s1438_s10 }
 0x40e   :  { %p1445_p3 = por %p1444_p2, %p1443_p1 }
 0x410   :  { %p1446_p4 = pnand %p1445_p3, %p1439_p0 }
 0x413   :  { %1279 = vmatmul.mubr.f32.vlgmr.msra.gmra.mrb[48].mxu0 %v1814_v9  ;;  %1300 = vmatmul.mubr.f32.vlgmr.msra.gmra.mrb[48].mxu1 %v814_v11 }
 0x414   :  { %1281 = vmatprep.mubr.f32.mxu0 %v1826_v18 }
 0x417   :  { %1282 = vmatmul.mubr.f32.gmra.mrb[50].mxu0 %v1837_v22 }
 0x418   :  { %1284 = vmatprep.mubr.f32.mxu0 %v1850_v14 }
 0x41b   :  { %1285 = vmatmul.mubr.f32.gmra.mrb[52].mxu0 %v1861_v31 }
 0x41c   :  { %1287 = vmatprep.mubr.f32.mxu0 %v1874_v36 }
 0x41f   :  { %1288 = vmatmul.mubr.f32.gmra.mrb[54].mxu0 %v1885_v40 }
 0x420   :  { %1290 = vmatprep.mubr.f32.mxu0 %v1898_v45 }
 0x423   :  { %1291 = vmatmul.mubr.f32.gmra.mrb[56].mxu0 %v1909_v49 }
 0x424   :  { %1293 = vmatprep.mubr.f32.mxu0 %v1922_v54 }
 0x427   :  { %1294 = vmatmul.mubr.f32.gmra.mrb[58].mxu0 %v790_v58 }
 0x428   :  { %1296 = vmatprep.mubr.f32.mxu0 %v796_v16 }
 0x42b   :  { %1297 = vmatmul.mubr.f32.gmra.mrb[60].mxu0 %v802_v63 }
 0x4e6   :  { %v1280_v2 = vpop.f32.mrb[48].mxu0  ;;  %v1301_v3 = vpop.f32.mrb[48].mxu1 }
 0x4e7   :  { %996 = vst [vmem:[#allocation2 + $0x8] sm:$0xff] %v1280_v2  ;;  %1010 = vst [vmem:[#allocation2 + $0x78] sm:$0xff] %v1301_v3  ;;  %v916_v9 = vpop.f32.mrb[49].mxu0  ;;  %v986_v18 = vpop.f32.mrb[49].mxu1 }
 0x4e8   :  { %995 = vst [vmem:[#allocation2] sm:$0xff] %v916_v9  ;;  %1009 = vst [vmem:[#allocation2 + $0x70] sm:$0xff] %v986_v18 }
 0x4ea   :  { %v1283_v20 = vpop.f32.mrb[50].mxu0 }
 0x4eb   :  { %998 = vst [vmem:[#allocation2 + $0x18] sm:$0xff] %v1283_v20  ;;  %v926_v21 = vpop.f32.mrb[51].mxu0 }
 0x4ec   :  { %997 = vst [vmem:[#allocation2 + $0x10] sm:$0xff] %v926_v21 }
 0x4ee   :  { %v1286_v22 = vpop.f32.mrb[52].mxu0 }
 0x4ef   :  { %1000 = vst [vmem:[#allocation2 + $0x28] sm:$0xff] %v1286_v22  ;;  %v936_v23 = vpop.f32.mrb[53].mxu0 }
 0x4f0   :  { %999 = vst [vmem:[#allocation2 + $0x20] sm:$0xff] %v936_v23 }
 0x4f2   :  { %v1289_v24 = vpop.f32.mrb[54].mxu0 }
 0x4f3   :  { %1002 = vst [vmem:[#allocation2 + $0x38] sm:$0xff] %v1289_v24  ;;  %v946_v26 = vpop.f32.mrb[55].mxu0 }
 0x4f4   :  { %1001 = vst [vmem:[#allocation2 + $0x30] sm:$0xff] %v946_v26 }
 0x4f6   :  { %v1292_v27 = vpop.f32.mrb[56].mxu0 }
 0x4f7   :  { %1004 = vst [vmem:[#allocation2 + $0x48] sm:$0xff] %v1292_v27  ;;  %v956_v14 = vpop.f32.mrb[57].mxu0 }
 0x4f8   :  { %1003 = vst [vmem:[#allocation2 + $0x40] sm:$0xff] %v956_v14 }
 0x4fa   :  { %v1295_v28 = vpop.f32.mrb[58].mxu0 }
 0x4fb   :  { %1006 = vst [vmem:[#allocation2 + $0x58] sm:$0xff] %v1295_v28  ;;  %v966_v29 = vpop.f32.mrb[59].mxu0 }
 0x4fc   :  { %1005 = vst [vmem:[#allocation2 + $0x50] sm:$0xff] %v966_v29 }
 0x4fe   :  { %v1298_v30 = vpop.f32.mrb[60].mxu0 }
 0x4ff   :  { %1008 = vst [vmem:[#allocation2 + $0x68] sm:$0xff] %v1298_v30  ;;  %v976_v31 = vpop.f32.mrb[61].mxu0 }
 0x500   :  { %1007 = vst [vmem:[#allocation2 + $0x60] sm:$0xff] %v976_v31 }
 0x501   :  { %1449 = shalt.err (!%p1446_p4)
}
 0x502   :  { %s1450_s12 = scalar_lea.hbm %s2001_s6, 2048 }
 0x503   :  { %p1451_p5 = scmp.ne.s32.totalorder %s2001_s6, %s1450_s12  ;;  %p1454_p6 = scmp.lt.u32.totalorder %s1450_s12, %s2001_s6 }
 0x505   :  { %p1456_p7 = pnand %p1454_p6, %p1451_p5 }
 0x507   :  { %1459 = shalt.err (!%p1456_p7)
}
 0x508   :  { %s1464_s17 = smov 128   ;;  %s1465_s18 = smov 8  }
 0x509   :  { %1022 = dma.vmem_to_hbm [thread:$0]  %s1017_s8, 2048, %s2001_s6, [#allocation3], %s1464_s17, %s1464_s17, %s1465_s18  }
 0x50a   :  { %1460 = dma.done.wait [#allocation3], 2048  }
 0x50b   :  { %1461 = vsyncadd [#allocation3], 4294965248 }
 0x50c   :  { %1034 = vsyncpa [#allocation3], 1 }

</bundles_post_ra>
